<compile_context>
chip_gen: v6e
topology: v6e:2x2x1
jax: 0.10.0
libtpu: 0.0.40
codegen_flags: <defaults>
</compile_context>

<pallas_src>
import functools

import jax
import jax.numpy as jnp
from jax.experimental import pallas as pl
from jax.experimental.pallas import tpu as pltpu


def _dice_kernel(pred_ref, tgt_ref, loss_ref, inter_acc, den_acc,
                 *, true_s, ts, need_mask):
    k = pl.program_id(1)

    @pl.when(k == 0)
    def _():
        inter_acc[...] = jnp.zeros_like(inter_acc)
        den_acc[...] = jnp.zeros_like(den_acc)

    x = pred_ref[...].astype(jnp.float32)
    t = tgt_ref[...].astype(jnp.float32)

    # sigmoid(x) = 0.5 * (tanh(0.5 * x) + 1): one EUP transcendental instead
    # of exp + reciprocal.
    p = 0.5 * (jnp.tanh(0.5 * x) + 1.0)

    if need_mask:
        # Mask out-of-range columns of the (possibly clamped) last S block.
        col = k * ts + jax.lax.broadcasted_iota(jnp.int32, p.shape, 1)
        valid = col < true_s
        p = jnp.where(valid, p, 0.0)
        t = jnp.where(valid, t, 0.0)

    inter_acc[...] += jnp.sum(p * t, axis=1, keepdims=True)
    den_acc[...] += jnp.sum(p + t, axis=1, keepdims=True)

    @pl.when(k == pl.num_programs(1) - 1)
    def _():
        num = 2.0 * inter_acc[...] + 1.0
        den = den_acc[...] + 1.0
        loss_ref[...] = (1.0 - num / den).astype(loss_ref.dtype)


def _round_up(x, m):
    return (x + m - 1) // m * m


@functools.partial(jax.jit, static_argnames=("reduction", "weight"))
def sigmoid_dice_loss_pallas(pred_logits, tgt_labels, reduction="mean", weight=1.0):
    G, S = pred_logits.shape

    # Large tiles to amortize per-grid-step overhead; clamped to problem size.
    # Worst case: 2 inputs x 2 buffers x (256*4096*4 B) = 16 MiB -> v7x-safe.
    TG = min(256, _round_up(G, 8))
    TS = min(4096, _round_up(S, 128))

    n_g = pl.cdiv(G, TG)
    n_s = pl.cdiv(S, TS)
    Gp = n_g * TG

    need_mask = (S % TS) != 0

    kernel = functools.partial(_dice_kernel, true_s=S, ts=TS, need_mask=need_mask)

    loss_g = pl.pallas_call(
        kernel,
        out_shape=jax.ShapeDtypeStruct((Gp, 1), jnp.float32),
        grid_spec=pltpu.PrefetchScalarGridSpec(
            num_scalar_prefetch=0,
            grid=(n_g, n_s),
            in_specs=[
                pl.BlockSpec((TG, TS), lambda i, k: (i, k)),
                pl.BlockSpec((TG, TS), lambda i, k: (i, k)),
            ],
            out_specs=pl.BlockSpec((TG, 1), lambda i, k: (i, 0)),
            scratch_shapes=[
                pltpu.VMEM((TG, 1), jnp.float32),   # intersection accumulator
                pltpu.VMEM((TG, 1), jnp.float32),   # fused denominator accumulator
            ],
        ),
        compiler_params=pltpu.CompilerParams(
            dimension_semantics=("parallel", "arbitrary"),
            vmem_limit_bytes=32 * 1024 * 1024,
        ),
    )(pred_logits, tgt_labels)

    loss_g = loss_g[:G, 0]

    if reduction == "none":
        loss = loss_g
    elif reduction == "mean":
        loss = jnp.mean(loss_g)
    elif reduction == "sum":
        loss = jnp.sum(loss_g)
    else:
        raise ValueError(f"Unsupported reduction: {reduction}")

    return weight * loss


def sigmoid_dice_loss_ref(pred_logits, tgt_labels, reduction="mean", weight=1.0):
    """Pure-JAX reference (mirrors the PyTorch sigmoid_dice_loss)."""
    p = jax.nn.sigmoid(pred_logits.astype(jnp.float32))
    t = tgt_labels.astype(jnp.float32)
    numerator = 2.0 * jnp.sum(p * t, axis=1)
    denominator = jnp.sum(p, axis=1) + jnp.sum(t, axis=1)
    loss_g = 1.0 - (numerator + 1.0) / (denominator + 1.0)
    if reduction == "none":
        loss = loss_g
    elif reduction == "mean":
        loss = jnp.mean(loss_g)
    else:
        loss = jnp.sum(loss_g)
    return weight * loss


if __name__ == "__main__":
    key = jax.random.PRNGKey(0)

    ok = True
    # (G, S): first case exercises ragged (unaligned) edges with a single grid
    # step; second case exercises multi-block accumulation along the S axis.
    for (num_groups, group_size) in ((6, 200), (24, 4608)):
        k1, k2 = jax.random.split(jax.random.fold_in(key, group_size))
        pred_logits = jax.random.normal(
            k1, (num_groups, group_size), dtype=jnp.float32
        )
        tgt_labels = (
            jax.random.uniform(k2, (num_groups, group_size)) > 0.5
        ).astype(jnp.int32)

        for reduction in ("mean", "sum", "none"):
            out = sigmoid_dice_loss_pallas(
                pred_logits, tgt_labels, reduction=reduction, weight=1.0
            )
            out = jax.block_until_ready(out)
            ref = sigmoid_dice_loss_ref(
                pred_logits, tgt_labels, reduction=reduction, weight=1.0
            )
            if not jnp.allclose(out, ref, atol=1e-5, rtol=1e-5):
                ok = False

    if ok:
        print("KERNEL_OK")
</pallas_src>

<mosaic_0001>
module attributes {stable_mosaic.version = 11 : i64} {
  func.func @_dice_kernel(%arg0: i32, %arg1: i32, %arg2: memref<8x256xf32, #tpu.memory_space<vmem>>, %arg3: memref<8x256xi32, #tpu.memory_space<vmem>>, %arg4: memref<8x1xf32, #tpu.memory_space<vmem>>, %arg5: memref<8x1xf32, #tpu.memory_space<vmem>>, %arg6: memref<8x1xf32, #tpu.memory_space<vmem>>) attributes {dimension_semantics = [#tpu.dimension_semantics<parallel>, #tpu.dimension_semantics<arbitrary>], iteration_bounds = array<i64: 1, 1>, scalar_prefetch = 0 : i64, scratch_operands = 2 : i64, tpu.core_type = #tpu.core_type<tc>, window_params = [{transform_indices = @transform_0, window_bounds = array<i64: 8, 256>}, {transform_indices = @transform_1, window_bounds = array<i64: 8, 256>}, {transform_indices = @transform_2, window_bounds = array<i64: 8, 1>}]} {
    %c0_i32 = arith.constant 0 : i32
    %0 = arith.cmpi eq, %arg1, %c0_i32 : i32
    %1 = arith.extui %0 : i1 to i32
    %c0_i32_0 = arith.constant 0 : i32
    %2 = arith.cmpi ne, %1, %c0_i32_0 : i32
    scf.if %2 {
      %cst_20 = arith.constant 0.000000e+00 : f32
      %38 = vector.broadcast %cst_20 : f32 to vector<8x1xf32>
      %c0_21 = arith.constant 0 : index
      %c0_22 = arith.constant 0 : index
      %39 = vector.load %arg5[%c0_21, %c0_22] : memref<8x1xf32, #tpu.memory_space<vmem>>, vector<8x1xf32>
      tpu.vector_store %arg5[%c0_21, %c0_22], %38 {strides = array<i32>} : memref<8x1xf32, #tpu.memory_space<vmem>>, vector<8x1xf32>,
      %cst_23 = arith.constant 0.000000e+00 : f32
      %40 = vector.broadcast %cst_23 : f32 to vector<8x1xf32>
      %c0_24 = arith.constant 0 : index
      %c0_25 = arith.constant 0 : index
      %41 = vector.load %arg6[%c0_24, %c0_25] : memref<8x1xf32, #tpu.memory_space<vmem>>, vector<8x1xf32>
      tpu.vector_store %arg6[%c0_24, %c0_25], %40 {strides = array<i32>} : memref<8x1xf32, #tpu.memory_space<vmem>>, vector<8x1xf32>,
    } else {
    }
    %c0 = arith.constant 0 : index
    %c0_1 = arith.constant 0 : index
    %3 = vector.load %arg2[%c0, %c0_1] : memref<8x256xf32, #tpu.memory_space<vmem>>, vector<8x256xf32>
    %c0_2 = arith.constant 0 : index
    %c0_3 = arith.constant 0 : index
    %4 = vector.load %arg3[%c0_2, %c0_3] : memref<8x256xi32, #tpu.memory_space<vmem>>, vector<8x256xi32>
    %5 = arith.sitofp %4 : vector<8x256xi32> to vector<8x256xf32>
    %cst = arith.constant 5.000000e-01 : f32
    %6 = vector.broadcast %cst : f32 to vector<8x256xf32>
    %7 = arith.mulf %6, %3 : vector<8x256xf32>
    %8 = math.tanh %7 : vector<8x256xf32>
    %cst_4 = arith.constant 1.000000e+00 : f32
    %9 = vector.broadcast %cst_4 : f32 to vector<8x256xf32>
    %10 = arith.addf %8, %9 : vector<8x256xf32>
    %cst_5 = arith.constant 5.000000e-01 : f32
    %11 = vector.broadcast %cst_5 : f32 to vector<8x256xf32>
    %12 = arith.mulf %11, %10 : vector<8x256xf32>
    %c256_i32 = arith.constant 256 : i32
    %13 = arith.muli %arg1, %c256_i32 : i32
    %14 = tpu.iota {dimensions = array<i32: 1>} : vector<8x256xi32>
    %15 = vector.broadcast %13 : i32 to vector<8x256xi32>
    %16 = arith.addi %15, %14 : vector<8x256xi32>
    %c200_i32 = arith.constant 200 : i32
    %17 = vector.broadcast %c200_i32 : i32 to vector<8x256xi32>
    %18 = arith.cmpi slt, %16, %17 : vector<8x256xi32>
    %cst_6 = arith.constant 0.000000e+00 : f32
    %19 = vector.broadcast %cst_6 : f32 to vector<8x256xf32>
    %20 = arith.select %18, %12, %19 : vector<8x256xi1>, vector<8x256xf32>
    %cst_7 = arith.constant 0.000000e+00 : f32
    %21 = vector.broadcast %cst_7 : f32 to vector<8x256xf32>
    %22 = arith.select %18, %5, %21 : vector<8x256xi1>, vector<8x256xf32>
    %c0_8 = arith.constant 0 : index
    %c0_9 = arith.constant 0 : index
    %23 = vector.load %arg5[%c0_8, %c0_9] : memref<8x1xf32, #tpu.memory_space<vmem>>, vector<8x1xf32>
    %24 = arith.mulf %20, %22 : vector<8x256xf32>
    %cst_10 = arith.constant dense<0.000000e+00> : vector<8xf32>
    %25 = vector.multi_reduction <add>, %24, %cst_10 [1] : vector<8x256xf32> to vector<8xf32>
    %26 = vector.shape_cast %25 : vector<8xf32> to vector<8x1xf32>
    %27 = arith.addf %23, %26 : vector<8x1xf32>
    %c0_11 = arith.constant 0 : index
    %c0_12 = arith.constant 0 : index
    %28 = vector.load %arg5[%c0_11, %c0_12] : memref<8x1xf32, #tpu.memory_space<vmem>>, vector<8x1xf32>
    tpu.vector_store %arg5[%c0_11, %c0_12], %27 {strides = array<i32>} : memref<8x1xf32, #tpu.memory_space<vmem>>, vector<8x1xf32>,
    %c0_13 = arith.constant 0 : index
    %c0_14 = arith.constant 0 : index
    %29 = vector.load %arg6[%c0_13, %c0_14] : memref<8x1xf32, #tpu.memory_space<vmem>>, vector<8x1xf32>
    %30 = arith.addf %20, %22 : vector<8x256xf32>
    %cst_15 = arith.constant dense<0.000000e+00> : vector<8xf32>
    %31 = vector.multi_reduction <add>, %30, %cst_15 [1] : vector<8x256xf32> to vector<8xf32>
    %32 = vector.shape_cast %31 : vector<8xf32> to vector<8x1xf32>
    %33 = arith.addf %29, %32 : vector<8x1xf32>
    %c0_16 = arith.constant 0 : index
    %c0_17 = arith.constant 0 : index
    %34 = vector.load %arg6[%c0_16, %c0_17] : memref<8x1xf32, #tpu.memory_space<vmem>>, vector<8x1xf32>
    tpu.vector_store %arg6[%c0_16, %c0_17], %33 {strides = array<i32>} : memref<8x1xf32, #tpu.memory_space<vmem>>, vector<8x1xf32>,
    %c0_i32_18 = arith.constant 0 : i32
    %35 = arith.cmpi eq, %arg1, %c0_i32_18 : i32
    %36 = arith.extui %35 : i1 to i32
    %c0_i32_19 = arith.constant 0 : i32
    %37 = arith.cmpi ne, %36, %c0_i32_19 : i32
    scf.if %37 {
      %c0_20 = arith.constant 0 : index
      %c0_21 = arith.constant 0 : index
      %38 = vector.load %arg5[%c0_20, %c0_21] : memref<8x1xf32, #tpu.memory_space<vmem>>, vector<8x1xf32>
      %cst_22 = arith.constant 2.000000e+00 : f32
      %39 = vector.broadcast %cst_22 : f32 to vector<8x1xf32>
      %40 = arith.mulf %39, %38 : vector<8x1xf32>
      %cst_23 = arith.constant 1.000000e+00 : f32
      %41 = vector.broadcast %cst_23 : f32 to vector<8x1xf32>
      %42 = arith.addf %40, %41 : vector<8x1xf32>
      %c0_24 = arith.constant 0 : index
      %c0_25 = arith.constant 0 : index
      %43 = vector.load %arg6[%c0_24, %c0_25] : memref<8x1xf32, #tpu.memory_space<vmem>>, vector<8x1xf32>
      %cst_26 = arith.constant 1.000000e+00 : f32
      %44 = vector.broadcast %cst_26 : f32 to vector<8x1xf32>
      %45 = arith.addf %43, %44 : vector<8x1xf32>
      %46 = arith.divf %42, %45 : vector<8x1xf32>
      %cst_27 = arith.constant 1.000000e+00 : f32
      %47 = vector.broadcast %cst_27 : f32 to vector<8x1xf32>
      %48 = arith.subf %47, %46 : vector<8x1xf32>
      %c0_28 = arith.constant 0 : index
      %c0_29 = arith.constant 0 : index
      %49 = vector.load %arg4[%c0_28, %c0_29] : memref<8x1xf32, #tpu.memory_space<vmem>>, vector<8x1xf32>
      tpu.vector_store %arg4[%c0_28, %c0_29], %48 {strides = array<i32>} : memref<8x1xf32, #tpu.memory_space<vmem>>, vector<8x1xf32>,
    } else {
    }
    return
  }
  func.func @transform_0(%arg0: i32, %arg1: i32) -> (i32, i32) {
    %c0_i32 = arith.constant 0 : i32
    return %arg0, %arg1 : i32, i32
  }
  func.func @transform_1(%arg0: i32, %arg1: i32) -> (i32, i32) {
    %c0_i32 = arith.constant 0 : i32
    return %arg0, %arg1 : i32, i32
  }
  func.func @transform_2(%arg0: i32, %arg1: i32) -> (i32, i32) {
    %c0_i32 = arith.constant 0 : i32
    %c0_i32_0 = arith.constant 0 : i32
    return %arg0, %c0_i32 : i32, i32
  }
}

</mosaic_0001>

<bundles_post_ra>
// kernel: sigmoid_dice_loss_pallas.1
= control target key start
LH: loop header
LB: loop body
LE: loop exit
PB: predicated region body
PF: predicated region fallthrough
CT: control target
= control target key end

     0   :  { %7 = vsyncpa [#allocation5], 0  ;;  %s189_s0 = inlined_call_operand.hbm [shape: f32[6,200], index: 0, kind: input, shape index: {}]   ;;  %s190_s1 = inlined_call_operand.hbm [shape: s32[6,200], index: 1, kind: input, shape index: {}]   ;;  %s191_s2 = inlined_call_operand.vmem [shape: f32[8,1], index: 2, kind: output, shape index: {}]  }
   0x1   :  { %8 = vsyncpa [#allocation7], 0  ;;  %s157_s9 = smov [#allocation4]   ;;  %s158_s11 = smov [#allocation6]  }
   0x2   :  { %s15_s10 = sshll.u32 %s157_s9, 4  ;;  %s25_s12 = sshll.u32 %s158_s11, 4  ;;  %s16_s10 = int_to_ptr.vmem [resolvable:$true] %s15_s10  ;;  %s26_s12 = int_to_ptr.vmem [resolvable:$true] %s25_s12 }
   0x3   :  { %s121_s13 = scalar_lea.vmem %s16_s10, 256  ;;  %p126_p1 = scmp.lt.s32.totalorder %s16_s10, %s16_s10 }
   0x4   :  { %p122_p0 = scmp.ne.s32.totalorder %s16_s10, %s121_s13  ;;  %p127_p2 = scmp.lt.s32.totalorder %s121_s13, %s121_s13 }
   0x6   :  { %p128_p3 = por %p127_p2, %p126_p1 }
   0x8   :  { %p129_p4 = pnand %p128_p3, %p122_p0 }
   0xa   :  { %132 = shalt.err (!%p129_p4)
}
   0xb   :  { %18 = dma.hbm_to_vmem [thread:$0]  %s189_s0, 256, %s16_s10, [#allocation5]  }
   0xc   :  { %s141_s16 = scalar_lea.vmem %s26_s12, 256  ;;  %p146_p6 = scmp.lt.s32.totalorder %s26_s12, %s26_s12 }
   0xd   :  { %p142_p5 = scmp.ne.s32.totalorder %s26_s12, %s141_s16  ;;  %p147_p7 = scmp.lt.s32.totalorder %s141_s16, %s141_s16 }
   0xf   :  { %p148_p8 = por %p147_p7, %p146_p6 }
  0x11   :  { %p149_p9 = pnand %p148_p8, %p142_p5 }
  0x13   :  { %152 = shalt.err (!%p149_p9)
}
  0x14   :  { %28 = dma.hbm_to_vmem [thread:$0]  %s190_s1, 256, %s26_s12, [#allocation7]  }
  0x15   :  { %153 = dma.done.wait [#allocation5], 256  }
  0x16   :  { %154 = vsyncadd [#allocation5], 4294967040 }
  0x17   :  { %155 = dma.done.wait [#allocation7], 256  }
  0x18   :  { %156 = vsyncadd [#allocation7], 4294967040  ;;  %vm39_vm0 = vcmask 7168   ;;  %v159_v0 = vmov 0.0   ;;  %v42_v1 = vld [vmem:[#allocation4] sm:$0xff]  ;;  %v43_v2 = vld [vmem:[#allocation4 + $0x8] sm:$0xff]  ;;  %v57_v5 = vlaneseq }
  0x19   :  { %41 = vst.msk [vmem:[#allocation3] sm:$0xff] %vm39_vm0, %v159_v0  ;;  %40 = vst.msk [vmem:[#allocation2] sm:$0xff] %vm39_vm0, %v159_v0  ;;  %v48_v3 = vmul.f32 0.5, %v42_v1  ;;  %v49_v4 = vmul.f32 0.5, %v43_v2  ;;  %v45_v7 = vld [vmem:[#allocation6 + $0x8] sm:$0xff]  ;;  %v44_v9 = vld [vmem:[#allocation6] sm:$0xff] }
  0x1a   :  { %v58_v6 = vand.u32 127, %v57_v5  ;;  %v47_v11 = vcvt.s32.f32 %v45_v7  ;;  %v46_v13 = vcvt.s32.f32 %v44_v9 }
  0x1b   :  { %107 = vtanh.f32 %v48_v3 }
  0x1c   :  { %109 = vtanh.f32 %v49_v4  ;;  %v59_v8 = vadd.s32 128, %v58_v6 }
  0x1e   :  { %vm64_vm1 = vcmp.lt.s32.totalorder %v59_v8, 200 }
  0x1f   :  { %v68_v18 = vsel %vm64_vm1, %v47_v11, 0.0 }
  0x20   :  { %v78_v26 = vld [vmem:[#allocation3] sm:$0xff]  ;;  %v69_v29 = vld [vmem:[#allocation2] sm:$0xff] }
  0x28   :  { %v108_v10 = vpop.eup %107 }
  0x29   :  { %v110_v12 = vpop.eup %109  ;;  %v52_v14 = vadd.f32 1.0, %v108_v10 }
  0x2a   :  { %v53_v15 = vadd.f32 1.0, %v110_v12 }
  0x2b   :  { %v54_v16 = vmul.f32 0.5, %v52_v14 }
  0x2c   :  { %v55_v17 = vmul.f32 0.5, %v53_v15 }
  0x2d   :  { %v79_v19 = vadd.f32 %v54_v16, %v46_v13  ;;  %v70_v22 = vmul.f32 %v54_v16, %v46_v13 }
  0x2e   :  { %v66_v20 = vsel %vm64_vm1, %v55_v17, 0.0 }
  0x2f   :  { %v80_v21 = vadd.f32 %v68_v18, %v66_v20  ;;  %v71_v23 = vmul.f32 %v68_v18, %v66_v20 }
  0x31   :  { %v81_v24 = vadd.f32 %v80_v21, %v79_v19  ;;  %v72_v25 = vadd.f32 %v71_v23, %v70_v22 }
  0x33   :  { %82 = vadd.xlane.f32.xlu0 %v81_v24 }
  0x37   :  { %73 = vadd.xlane.f32.xlu0 %v72_v25 }
  0xbc   :  { %v83_v27 = vpop.xlane.xlu0 %82 }
  0xbd   :  { %v84_v28 = vadd.f32 %v83_v27, %v78_v26 }
  0xbf   :  { %85 = vst.msk [vmem:[#allocation3] sm:$0xff] %vm39_vm0, %v84_v28 }
  0xc0   :  { %v74_v30 = vpop.xlane.xlu0 %73 }
  0xc1   :  { %v75_v31 = vadd.f32 %v74_v30, %v69_v29 }
  0xc3   :  { %77 = vst.msk [vmem:[#allocation2] sm:$0xff] %vm39_vm0, %v75_v31 }
  0xc6   :  { %v92_v32 = vld [vmem:[#allocation3] sm:$0xff] }
  0xc7   :  { %v93_v33 = vadd.f32 1.0, %v92_v32 }
  0xc9   :  { %111 = vrcp.f32 %v93_v33 }
  0xca   :  { %v89_v34 = vld [vmem:[#allocation2] sm:$0xff] }
  0xcb   :  { %v90_v35 = vmul.f32 2.0, %v89_v34 }
  0xcd   :  { %v91_v36 = vadd.f32 1.0, %v90_v35 }
  0xd6   :  { %v112_v37 = vpop.eup %111 }
  0xd7   :  { %v95_v38 = vmul.f32 %v112_v37, %v91_v36 }
  0xd9   :  { %v96_v39 = vsub.f32 1.0, %v95_v38 }
  0xdb   :  { %97 = vst.msk [vmem:[%s191_s2] sm:$0xff] %vm39_vm0, %v96_v39 }
  0xdc   :  { %102 = vsyncpa [#allocation5], 1 }
  0xdd   :  { %103 = vsyncpa [#allocation7], 1 }

</bundles_post_ra>
